<compile_context>
chip_gen: v7x
topology: tpu7x:2x2x1
jax: 0.10.0
libtpu: 0.0.40
codegen_flags: <defaults>
</compile_context>

<pallas_src>
import jax
import jax.numpy as jnp
from jax.experimental import pallas as pl
from jax.experimental.pallas import tpu as pltpu

_LANE = 128
_SUBLANE = 8
_SQRT_2_OVER_PI = 0.7978845608028654


def _round_up(x, m):
  return ((x + m - 1) // m) * m


def _gelu(x):
  # tanh-approximate GELU: tanh runs on the EUP slot (nearly free next to the
  # MXU / DMA) instead of a 10+ op erf polynomial on the VALU.
  # TODO(synk): torch.nn.GELU() default is the exact erf GELU; the tanh
  # approximation differs by ~1e-3 relative.
  return 0.5 * x * (1.0 + jnp.tanh(_SQRT_2_OVER_PI * (x + 0.044715 * x * x * x)))


def _mm(a, b):
  return jnp.dot(a, b, preferred_element_type=jnp.float32)


def _pick_tiles(n):
  """Row tile TM, K tile TK (both multiples of 128, TM | TK) and padded N."""
  n128 = _round_up(max(n, 1), _LANE)
  tk = min(2048, n128)
  n_pad = _round_up(max(n, 1), tk)
  tm = _LANE
  while tm * 2 <= min(512, tk) and tk % (tm * 2) == 0:
    tm *= 2
  return tm, tk, n_pad


# ---------------------------------------------------------------------------
# Kernel 1 (the only O(N^2) kernel): fused node transform + streamed
# aggregation + pooling partials.
#   grid = (row tiles, K tiles).  A (bf16) is the only O(N^2) operand and the
#   dominant stream; X[TK, F] streams alongside it (F*4 bytes/row ~ 2-3% of
#   A's bytes); W_full / biases are tiny residents.  Per k step the [TK, C]
#   H0 block is recomputed (H0 = X @ W_full + b_comp, cast bf16) and fed to
#   the MXU against the A tile, accumulating into a f32 VMEM scratch.
#   The epilogue (GCN bias + GELU + pooling-partial matmul, bf16 inputs / f32
#   accumulate) runs once per row tile under pl.when(k == last).
# ---------------------------------------------------------------------------
def _agg_pool_kernel(a_ref, x_ref, wf_ref, bc_ref, pool_ref, gb_ref,
                     out_ref, acc_ref):
  k = pl.program_id(1)

  @pl.when(k == 0)
  def _():
    acc_ref[...] = jnp.zeros_like(acc_ref)

  # H0 block for this K tile: [TK, F] @ [F, C_pad] + [1, C_pad], bf16 for MXU.
  h0 = (_mm(x_ref[...], wf_ref[...]) + bc_ref[...]).astype(jnp.bfloat16)
  acc_ref[...] += _mm(a_ref[...], h0)                        # bf16 x bf16 -> f32

  @pl.when(k == pl.num_programs(1) - 1)
  def _():
    h1 = _gelu(acc_ref[...] + gb_ref[...])                   # [TM, C_pad] f32
    out_ref[...] = _mm(pool_ref[...], h1.astype(jnp.bfloat16))  # [B_pad, C_pad]


# ---------------------------------------------------------------------------
# Kernel 2: tiny per-graph head (fn_embeddings MLP + backbone MLP).
# Everything is a few KiB; output padded to a lane-dense width.
# ---------------------------------------------------------------------------
def _head_kernel(pooled_ref, extra_ref,
                 fn_w1_ref, fn_b1_ref, fn_w2_ref, fn_b2_ref,
                 bb_w1a_ref, bb_w1b_ref, bb_b1_ref, bb_w2_ref, bb_b2_ref,
                 out_ref):
  # fn_embeddings: Linear(3,16) -> GELU -> Linear(16,3)
  fe = _gelu(_mm(extra_ref[...], fn_w1_ref[...]) + fn_b1_ref[...])
  fe = _mm(fe, fn_w2_ref[...]) + fn_b2_ref[...]               # [B_pad, 3]
  # backbone: cat([pooled, fe], 1) @ W1 (split matmul) + b1 -> GELU -> Linear(nhid, 1)
  z = _gelu(_mm(pooled_ref[...], bb_w1a_ref[...]) + _mm(fe, bb_w1b_ref[...])
            + bb_b1_ref[...])                                 # [B_pad, nhid]
  out_ref[...] = _mm(z, bb_w2_ref[...]) + bb_b2_ref[...]      # [B_pad, out_pad]


def init_params(key, num_features, nhid=32):
  """Deterministic synthetic parameters with the shapes __init__ implies."""
  emb_out = 64 - num_features + 2
  gcn_out = nhid - 3
  keys = list(jax.random.split(key, 8))
  kit = iter(keys)

  def lin(fan_in, fan_out):
    kw, kb = jax.random.split(next(kit))
    bound = 1.0 / jnp.sqrt(jnp.float32(fan_in))
    w = jax.random.uniform(kw, (fan_in, fan_out), jnp.float32, -bound, bound)
    b = jax.random.uniform(kb, (1, fan_out), jnp.float32, -bound, bound)
    return w, b

  p = {}
  p["msg_weights"] = jax.random.normal(next(kit), (3,), jnp.float32)
  p["emb_w"], p["emb_b"] = lin(2, emb_out)                  # nn.Linear(2, 64-F+2)
  gw, _ = lin(64, gcn_out)                                  # GCNConv(64, nhid-3)
  p["gcn_w"], p["gcn_b"] = gw, jnp.zeros((1, gcn_out), jnp.float32)  # PyG bias zero-init
  p["fn_w1"], p["fn_b1"] = lin(3, 16)                       # fn_embeddings[0]
  p["fn_w2"], p["fn_b2"] = lin(16, 3)                       # fn_embeddings[2]
  p["bb_w1"], p["bb_b1"] = lin(nhid, nhid)                  # backbone_fc[0]
  p["bb_w2"], p["bb_b2"] = lin(nhid, 1)                     # backbone_fc[-1]
  return p


def gcn_w_global_forward(params, x, edge_index, batch, known_mask, unk_mask,
                         obs_mask, fn_averages, infection_rates, num_graphs,
                         num_features, nhid=32):
  N = x.shape[0]
  E = edge_index.shape[1]
  emb_out = 64 - num_features + 2
  gcn_out = nhid - 3
  B = num_graphs
  f32 = jnp.float32
  bf16 = jnp.bfloat16

  c_pad = _round_up(gcn_out, _LANE)           # lane-dense aggregation output
  b_pad = _round_up(B, _SUBLANE)
  tm, tk, n_pad = _pick_tiles(N)              # TM | TK | n_pad, all mult. of 128
  ni, nk = n_pad // tm, n_pad // tk

  # --- glue: edge weights from softmax(msg_weights), scattered by mask index.
  # (The PyTorch code casts the masks to int and index-assigns; we interpret
  #  them as integer edge-index sets -- pass index arrays, not booleans.)
  sm = jax.nn.softmax(params["msg_weights"])
  ew = jnp.ones((E,), f32)
  ew = ew.at[known_mask].set(sm[0])
  ew = ew.at[unk_mask].set(sm[1])
  ew = ew.at[obs_mask].set(sm[2])

  # --- glue: PyG gcn_norm (self loops w=1, D^-1/2 A D^-1/2) as a dense,
  # zero-padded [n_pad, n_pad] normalized adjacency, built directly in bf16
  # (no f32 O(N^2) intermediate + cast round trip).
  ar = jnp.arange(N, dtype=edge_index.dtype)
  src = jnp.concatenate([edge_index[0], ar])
  dst = jnp.concatenate([edge_index[1], ar])
  w = jnp.concatenate([ew, jnp.ones((N,), f32)])
  deg = jnp.zeros((N,), f32).at[dst].add(w)
  dinv = jnp.where(deg > 0.0, jax.lax.rsqrt(deg), 0.0)
  norm = (dinv[src] * w * dinv[dst]).astype(bf16)
  a_norm = jnp.zeros((n_pad, n_pad), bf16).at[dst, src].add(norm)  # A[i, j]: j -> i

  # --- glue: global_add_pool as a dense bf16 pooling matrix (padded nodes /
  # graphs get all-zero columns / rows, so they contribute nothing).
  batch_pad = jnp.full((n_pad,), -1, jnp.int32).at[:N].set(batch.astype(jnp.int32))
  pool = (batch_pad[None, :] ==
          jnp.arange(b_pad, dtype=jnp.int32)[:, None]).astype(bf16)

  extra = jnp.concatenate(
      [fn_averages.reshape(-1, 2), infection_rates.reshape(-1, 1)], axis=1
  ).astype(f32)
  extra = jnp.zeros((b_pad, 3), f32).at[:B].set(extra)

  # --- glue: compose emb Linear with the GCNConv weight (pure weight algebra)
  # so the node transform is a single [TK, F] @ [F, C_pad] matmul in-kernel.
  w_a = params["gcn_w"][:emb_out, :]                          # [emb_out, gcn_out]
  w_b = params["gcn_w"][emb_out:, :]                          # [F-2,    gcn_out]
  w_full = jnp.concatenate([params["emb_w"] @ w_a, w_b], axis=0)   # [F, gcn_out]
  b_comp = params["emb_b"] @ w_a                              # [1, gcn_out]
  w_full = jnp.zeros((num_features, c_pad), f32).at[:, :gcn_out].set(w_full)
  b_comp = jnp.zeros((1, c_pad), f32).at[:, :gcn_out].set(b_comp)
  gcn_b = jnp.zeros((1, c_pad), f32).at[:, :gcn_out].set(params["gcn_b"])

  x_pad = jnp.zeros((n_pad, num_features), f32).at[:N].set(x.astype(f32))

  # ---- kernel 1: fused node transform + A @ H0 aggregation + GELU + pooling
  # partials.  N-independent VMEM budget (sum of real allocations + headroom).
  vmem_limit = int(
      2 * tm * tk * 2                      # A tile, bf16, double buffered
      + 2 * tk * num_features * 4          # X K-block, f32
      + 2 * num_features * c_pad * 4       # W_full (resident, tiny)
      + 2 * b_pad * tm * 2                 # pool row block, bf16
      + 2 * b_pad * c_pad * 4              # output slab
      + 4 * c_pad * 4                      # biases
      + tm * c_pad * 4                     # f32 accumulator scratch
      + (8 << 20))                         # headroom / internal scratch

  pooled_parts = pl.pallas_call(
      _agg_pool_kernel,
      out_shape=jax.ShapeDtypeStruct((ni, b_pad, c_pad), jnp.float32),
      grid_spec=pltpu.PrefetchScalarGridSpec(
          num_scalar_prefetch=0, grid=(ni, nk),
          in_specs=[
              pl.BlockSpec((tm, tk), lambda i, k: (i, k)),          # A tile (streams)
              pl.BlockSpec((tk, num_features), lambda i, k: (k, 0)),  # X K-block
              pl.BlockSpec((num_features, c_pad), lambda i, k: (0, 0)),  # W_full
              pl.BlockSpec((1, c_pad), lambda i, k: (0, 0)),        # composed emb bias
              pl.BlockSpec((b_pad, tm), lambda i, k: (0, i)),       # pool columns
              pl.BlockSpec((1, c_pad), lambda i, k: (0, 0)),        # GCN bias
          ],
          out_specs=pl.BlockSpec((None, b_pad, c_pad), lambda i, k: (i, 0, 0)),
          scratch_shapes=[pltpu.VMEM((tm, c_pad), jnp.float32)]),
      compiler_params=pltpu.CompilerParams(
          dimension_semantics=("parallel", "arbitrary"),
          vmem_limit_bytes=vmem_limit),
  )(a_norm, x_pad, w_full, b_comp, pool, gcn_b)

  # Tiny cross-row-tile reduction of the pooling partials (O(ni * B * C)).
  pooled = jnp.sum(pooled_parts, axis=0)                     # [B_pad, C_pad]

  # ---- kernel 2: per-graph head MLPs (single block, everything tiny;
  # output padded to a lane-dense width, sliced outside).
  out_pad = _LANE
  bb_w1a = jnp.zeros((c_pad, nhid), f32).at[:gcn_out].set(params["bb_w1"][:gcn_out])
  bb_w1b = params["bb_w1"][gcn_out:]                         # [3, nhid]
  bb_w2 = jnp.zeros((nhid, out_pad), f32).at[:, :1].set(params["bb_w2"])
  bb_b2 = jnp.zeros((1, out_pad), f32).at[:, :1].set(params["bb_b2"])

  vmem_spec = pl.BlockSpec(memory_space=pltpu.MemorySpace.VMEM)
  head_operands = [
      pooled, extra,
      params["fn_w1"], params["fn_b1"], params["fn_w2"], params["fn_b2"],
      bb_w1a, bb_w1b, params["bb_b1"], bb_w2, bb_b2,
  ]
  logits = pl.pallas_call(
      _head_kernel,
      out_shape=jax.ShapeDtypeStruct((b_pad, out_pad), jnp.float32),
      in_specs=[vmem_spec] * len(head_operands),
      out_specs=vmem_spec,
  )(*head_operands)

  return logits[:B, :1]


if __name__ == "__main__":
  num_features, nhid = 6, 32
  N, B, E = 16, 2, 24

  key = jax.random.PRNGKey(0)
  kx, ke, ko, kfn, kir = jax.random.split(key, 5)

  # Node features [N, num_features].
  x = jax.random.normal(kx, (N, num_features), jnp.float32)

  # Two graphs of 8 nodes each; random within-graph edges without self loops.
  nodes_per_graph = N // B
  graph_of_edge = jnp.repeat(jnp.arange(B, dtype=jnp.int32), E // B)
  src_local = jax.random.randint(ke, (E,), 0, nodes_per_graph, dtype=jnp.int32)
  off = jax.random.randint(ko, (E,), 1, nodes_per_graph, dtype=jnp.int32)
  dst_local = (src_local + off) % nodes_per_graph
  src = src_local + graph_of_edge * nodes_per_graph
  dst = dst_local + graph_of_edge * nodes_per_graph
  edge_index = jnp.stack([src, dst])                         # [2, E]
  batch = jnp.repeat(jnp.arange(B, dtype=jnp.int32), nodes_per_graph)  # [N]

  # Edge-index sets selecting which learned message weight each edge gets.
  known_mask = jnp.arange(0, E // 3, dtype=jnp.int32)
  unk_mask = jnp.arange(E // 3, 2 * E // 3, dtype=jnp.int32)
  obs_mask = jnp.arange(2 * E // 3, E, dtype=jnp.int32)

  # Per-graph global features.
  fn_averages = jax.random.normal(kfn, (B, 2), jnp.float32)
  infection_rates = jax.random.uniform(kir, (B,), jnp.float32)

  params = init_params(jax.random.PRNGKey(1), num_features, nhid)

  logits = gcn_w_global_forward(params, x, edge_index, batch, known_mask,
                                unk_mask, obs_mask, fn_averages,
                                infection_rates, B, num_features, nhid)
  jax.block_until_ready(logits)
  assert logits.shape == (B, 1) and logits.dtype == jnp.float32
  print("KERNEL_OK")
</pallas_src>

<mosaic_0001>
module attributes {stable_mosaic.version = 11 : i64} {
  func.func @_agg_pool_kernel(%arg0: i32, %arg1: i32, %arg2: memref<128x128xbf16, #tpu.memory_space<vmem>>, %arg3: memref<128x6xf32, #tpu.memory_space<vmem>>, %arg4: memref<6x128xf32, #tpu.memory_space<vmem>>, %arg5: memref<1x128xf32, #tpu.memory_space<vmem>>, %arg6: memref<8x128xbf16, #tpu.memory_space<vmem>>, %arg7: memref<1x128xf32, #tpu.memory_space<vmem>>, %arg8: memref<1x8x128xf32, #tpu.memory_space<vmem>>, %arg9: memref<128x128xf32, #tpu.memory_space<vmem>>) attributes {dimension_semantics = [#tpu.dimension_semantics<parallel>, #tpu.dimension_semantics<arbitrary>], iteration_bounds = array<i64: 1, 1>, scalar_prefetch = 0 : i64, scratch_operands = 1 : i64, tpu.core_type = #tpu.core_type<tc>, window_params = [{transform_indices = @transform_0, window_bounds = array<i64: 128, 128>}, {transform_indices = @transform_1, window_bounds = array<i64: 128, 6>}, {pipeline_mode = #tpu.pipeline_mode<synchronous>, transform_indices = @transform_2, window_bounds = array<i64: 6, 128>}, {pipeline_mode = #tpu.pipeline_mode<synchronous>, transform_indices = @transform_3, window_bounds = array<i64: 1, 128>}, {transform_indices = @transform_4, window_bounds = array<i64: 8, 128>}, {pipeline_mode = #tpu.pipeline_mode<synchronous>, transform_indices = @transform_5, window_bounds = array<i64: 1, 128>}, {transform_indices = @transform_6, window_bounds = array<i64: 1, 8, 128>}]} {
    %c0_i32 = arith.constant 0 : i32
    %0 = arith.cmpi eq, %arg1, %c0_i32 : i32
    %1 = arith.extui %0 : i1 to i32
    %c0_i32_0 = arith.constant 0 : i32
    %2 = arith.cmpi ne, %1, %c0_i32_0 : i32
    scf.if %2 {
      %cst_15 = arith.constant 0.000000e+00 : f32
      %18 = vector.broadcast %cst_15 : f32 to vector<128x128xf32>
      %c0_16 = arith.constant 0 : index
      %c0_17 = arith.constant 0 : index
      %19 = vector.load %arg9[%c0_16, %c0_17] : memref<128x128xf32, #tpu.memory_space<vmem>>, vector<128x128xf32>
      tpu.vector_store %arg9[%c0_16, %c0_17], %18 {strides = array<i32>} : memref<128x128xf32, #tpu.memory_space<vmem>>, vector<128x128xf32>,
    } else {
    }
    %c0 = arith.constant 0 : index
    %c0_1 = arith.constant 0 : index
    %3 = vector.load %arg3[%c0, %c0_1] : memref<128x6xf32, #tpu.memory_space<vmem>>, vector<128x6xf32>
    %c0_2 = arith.constant 0 : index
    %c0_3 = arith.constant 0 : index
    %4 = vector.load %arg4[%c0_2, %c0_3] : memref<6x128xf32, #tpu.memory_space<vmem>>, vector<6x128xf32>
    %cst = arith.constant dense<0.000000e+00> : vector<128x128xf32>
    %5 = tpu.matmul %3, %4, %cst {dimension_numbers = #tpu.dot_dimension_numbers<[1], [0], [0], [1], [0, 0, 1, 1], [], []>} : vector<128x6xf32>, vector<6x128xf32>, vector<128x128xf32> -> vector<128x128xf32>
    %c0_4 = arith.constant 0 : index
    %c0_5 = arith.constant 0 : index
    %6 = vector.load %arg5[%c0_4, %c0_5] : memref<1x128xf32, #tpu.memory_space<vmem>>, vector<1x128xf32>
    %7 = vector.broadcast %6 : vector<1x128xf32> to vector<128x128xf32>
    %8 = arith.addf %5, %7 : vector<128x128xf32>
    %9 = arith.truncf %8 : vector<128x128xf32> to vector<128x128xbf16>
    %c0_6 = arith.constant 0 : index
    %c0_7 = arith.constant 0 : index
    %10 = vector.load %arg9[%c0_6, %c0_7] : memref<128x128xf32, #tpu.memory_space<vmem>>, vector<128x128xf32>
    %c0_8 = arith.constant 0 : index
    %c0_9 = arith.constant 0 : index
    %11 = vector.load %arg2[%c0_8, %c0_9] : memref<128x128xbf16, #tpu.memory_space<vmem>>, vector<128x128xbf16>
    %cst_10 = arith.constant dense<0.000000e+00> : vector<128x128xf32>
    %12 = tpu.matmul %11, %9, %cst_10 {dimension_numbers = #tpu.dot_dimension_numbers<[1], [0], [0], [1], [0, 0, 1, 1], [], []>} : vector<128x128xbf16>, vector<128x128xbf16>, vector<128x128xf32> -> vector<128x128xf32>
    %13 = arith.addf %10, %12 : vector<128x128xf32>
    %c0_11 = arith.constant 0 : index
    %c0_12 = arith.constant 0 : index
    %14 = vector.load %arg9[%c0_11, %c0_12] : memref<128x128xf32, #tpu.memory_space<vmem>>, vector<128x128xf32>
    tpu.vector_store %arg9[%c0_11, %c0_12], %13 {strides = array<i32>} : memref<128x128xf32, #tpu.memory_space<vmem>>, vector<128x128xf32>,
    %c0_i32_13 = arith.constant 0 : i32
    %15 = arith.cmpi eq, %arg1, %c0_i32_13 : i32
    %16 = arith.extui %15 : i1 to i32
    %c0_i32_14 = arith.constant 0 : i32
    %17 = arith.cmpi ne, %16, %c0_i32_14 : i32
    scf.if %17 {
      %c0_15 = arith.constant 0 : index
      %c0_16 = arith.constant 0 : index
      %18 = vector.load %arg9[%c0_15, %c0_16] : memref<128x128xf32, #tpu.memory_space<vmem>>, vector<128x128xf32>
      %c0_17 = arith.constant 0 : index
      %c0_18 = arith.constant 0 : index
      %19 = vector.load %arg7[%c0_17, %c0_18] : memref<1x128xf32, #tpu.memory_space<vmem>>, vector<1x128xf32>
      %20 = vector.broadcast %19 : vector<1x128xf32> to vector<128x128xf32>
      %21 = arith.addf %18, %20 : vector<128x128xf32>
      %cst_19 = arith.constant 5.000000e-01 : f32
      %22 = vector.broadcast %cst_19 : f32 to vector<128x128xf32>
      %23 = arith.mulf %22, %21 : vector<128x128xf32>
      %cst_20 = arith.constant 4.471500e-02 : f32
      %24 = vector.broadcast %cst_20 : f32 to vector<128x128xf32>
      %25 = arith.mulf %24, %21 : vector<128x128xf32>
      %26 = arith.mulf %25, %21 : vector<128x128xf32>
      %27 = arith.mulf %26, %21 : vector<128x128xf32>
      %28 = arith.addf %21, %27 : vector<128x128xf32>
      %cst_21 = arith.constant 0.797884583 : f32
      %29 = vector.broadcast %cst_21 : f32 to vector<128x128xf32>
      %30 = arith.mulf %29, %28 : vector<128x128xf32>
      %31 = math.tanh %30 : vector<128x128xf32>
      %cst_22 = arith.constant 1.000000e+00 : f32
      %32 = vector.broadcast %cst_22 : f32 to vector<128x128xf32>
      %33 = arith.addf %32, %31 : vector<128x128xf32>
      %34 = arith.mulf %23, %33 : vector<128x128xf32>
      %c0_23 = arith.constant 0 : index
      %c0_24 = arith.constant 0 : index
      %35 = vector.load %arg6[%c0_23, %c0_24] : memref<8x128xbf16, #tpu.memory_space<vmem>>, vector<8x128xbf16>
      %36 = arith.truncf %34 : vector<128x128xf32> to vector<128x128xbf16>
      %cst_25 = arith.constant dense<0.000000e+00> : vector<8x128xf32>
      %37 = tpu.matmul %35, %36, %cst_25 {dimension_numbers = #tpu.dot_dimension_numbers<[1], [0], [0], [1], [0, 0, 1, 1], [], []>} : vector<8x128xbf16>, vector<128x128xbf16>, vector<8x128xf32> -> vector<8x128xf32>
      %c0_26 = arith.constant 0 : index
      %c0_27 = arith.constant 0 : index
      %c0_28 = arith.constant 0 : index
      %38 = vector.load %arg8[%c0_26, %c0_27, %c0_28] : memref<1x8x128xf32, #tpu.memory_space<vmem>>, vector<1x8x128xf32>
      %39 = vector.shape_cast %38 : vector<1x8x128xf32> to vector<8x128xf32>
      %40 = vector.shape_cast %37 : vector<8x128xf32> to vector<1x8x128xf32>
      tpu.vector_store %arg8[%c0_26, %c0_27, %c0_28], %40 {strides = array<i32>} : memref<1x8x128xf32, #tpu.memory_space<vmem>>, vector<1x8x128xf32>,
    } else {
    }
    return
  }
  func.func @transform_0(%arg0: i32, %arg1: i32) -> (i32, i32) {
    %c0_i32 = arith.constant 0 : i32
    return %arg0, %arg1 : i32, i32
  }
  func.func @transform_1(%arg0: i32, %arg1: i32) -> (i32, i32) {
    %c0_i32 = arith.constant 0 : i32
    %c0_i32_0 = arith.constant 0 : i32
    return %arg1, %c0_i32 : i32, i32
  }
  func.func @transform_2(%arg0: i32, %arg1: i32) -> (i32, i32) {
    %c0_i32 = arith.constant 0 : i32
    %c0_i32_0 = arith.constant 0 : i32
    %c0_i32_1 = arith.constant 0 : i32
    return %c0_i32, %c0_i32_0 : i32, i32
  }
  func.func @transform_3(%arg0: i32, %arg1: i32) -> (i32, i32) {
    %c0_i32 = arith.constant 0 : i32
    %c0_i32_0 = arith.constant 0 : i32
    %c0_i32_1 = arith.constant 0 : i32
    return %c0_i32, %c0_i32_0 : i32, i32
  }
  func.func @transform_4(%arg0: i32, %arg1: i32) -> (i32, i32) {
    %c0_i32 = arith.constant 0 : i32
    %c0_i32_0 = arith.constant 0 : i32
    return %c0_i32, %arg0 : i32, i32
  }
  func.func @transform_5(%arg0: i32, %arg1: i32) -> (i32, i32) {
    %c0_i32 = arith.constant 0 : i32
    %c0_i32_0 = arith.constant 0 : i32
    %c0_i32_1 = arith.constant 0 : i32
    return %c0_i32, %c0_i32_0 : i32, i32
  }
  func.func @transform_6(%arg0: i32, %arg1: i32) -> (i32, i32, i32) {
    %c0_i32 = arith.constant 0 : i32
    %c0_i32_0 = arith.constant 0 : i32
    %c0_i32_1 = arith.constant 0 : i32
    return %arg0, %c0_i32, %c0_i32_0 : i32, i32, i32
  }
}

</mosaic_0001>

<bundles_post_ra>
// kernel: tpu_custom_call.1
= control target key start
LH: loop header
LB: loop body
LE: loop exit
PB: predicated region body
PF: predicated region fallthrough
CT: control target
= control target key end

     0   :  { %vm118_vm0 = vcmask 1045504   ;;  %vm69_vm1 = vcmask 48128   ;;  %s1216_s0 = inlined_call_operand.vmem [shape: bf16[128,128], index: 0, kind: input, shape index: {}]   ;;  %s1217_s1 = inlined_call_operand.vmem [shape: f32[128,6], index: 1, kind: input, shape index: {}]   ;;  %s1218_s2 = inlined_call_operand.vmem [shape: f32[6,128], index: 2, kind: input, shape index: {}]   ;;  %s1219_s3 = inlined_call_operand.vmem [shape: f32[1,128], index: 3, kind: input, shape index: {}]   ;;  %s1220_s4 = inlined_call_operand.vmem [shape: bf16[8,128], index: 4, kind: input, shape index: {}]   ;;  %s1221_s5 = inlined_call_operand.vmem [shape: f32[1,128], index: 5, kind: input, shape index: {}]   ;;  %s1222_s6 = inlined_call_operand.hbm [shape: f32[1,8,128], index: 6, kind: output, shape index: {}]  }
   0x1   :  { %v61_v0 = vld [vmem:[%s1218_s2] sm:$0x3f]  ;;  %v46_v2 = vld [vmem:[%s1217_s1 + $0x8] sm:$0xff]  ;;  %v47_v3 = vld [vmem:[%s1217_s1 + $0x10] sm:$0xff] }
   0x2   :  { %v45_v1 = vld [vmem:[%s1217_s1] sm:$0xff]  ;;  %803 = vmatprep.subr.msk.mxu0 %vm118_vm0, %v61_v0  ;;  %v48_v4 = vld [vmem:[%s1217_s1 + $0x18] sm:$0xff]  ;;  %v50_v6 = vld [vmem:[%s1217_s1 + $0x28] sm:$0xff] }
   0x3   :  { %805 = vmatprep.mubr.msk.f32.mxu0 %vm69_vm1, %v45_v1  ;;  %804 = vmatpush3.msk.msra.mxu0 %vm118_vm0, %v61_v0  ;;  %v49_v5 = vld [vmem:[%s1217_s1 + $0x20] sm:$0xff]  ;;  %v51_v7 = vld [vmem:[%s1217_s1 + $0x30] sm:$0xff] }
   0x4   :  { %806 = vmatmul.mubr.msk.f32.vlgmr.msra.gmra.mrb[0].mxu0 %vm69_vm1, %v46_v2 }
   0x5   :  { %808 = vmatprep.mubr.msk.f32.mxu0 %vm69_vm1, %v47_v3 }
   0x8   :  { %809 = vmatmul.mubr.msk.f32.gmra.mrb[2].mxu0 %vm69_vm1, %v48_v4 }
   0x9   :  { %811 = vmatprep.mubr.msk.f32.mxu0 %vm69_vm1, %v49_v5 }
   0xc   :  { %812 = vmatmul.mubr.msk.f32.gmra.mrb[4].mxu0 %vm69_vm1, %v50_v6 }
   0xd   :  { %11 = vsyncpa [#allocation4], 0  ;;  %814 = vmatprep.mubr.msk.f32.mxu0 %vm69_vm1, %v51_v7  ;;  %v52_v8 = vld [vmem:[%s1217_s1 + $0x38] sm:$0xff]  ;;  %v53_v9 = vld [vmem:[%s1217_s1 + $0x40] sm:$0xff]  ;;  %v948_v2 = vmov 0.0   ;;  %vm949_vm2 = vmmov 0  }
   0xe   :  { %v54_v10 = vld [vmem:[%s1217_s1 + $0x48] sm:$0xff]  ;;  %v55_v11 = vld [vmem:[%s1217_s1 + $0x50] sm:$0xff]  ;;  %v56_v12 = vld [vmem:[%s1217_s1 + $0x58] sm:$0xff]  ;;  %861 = vmatprep.subr.bf16.mxu0 %v948_v2  ;;  %s950_s23 = smov [#allocation3]  }
   0xf   :  { %v57_v13 = vld [vmem:[%s1217_s1 + $0x60] sm:$0xff]  ;;  %v58_v14 = vld [vmem:[%s1217_s1 + $0x68] sm:$0xff]  ;;  %v59_v15 = vld [vmem:[%s1217_s1 + $0x70] sm:$0xff]  ;;  %s726_s24 = sshll.u32 %s950_s23, 4  ;;  %s727_s24 = int_to_ptr.vmem [resolvable:$true] %s726_s24 }
  0x10   :  { %815 = vmatmul.mubr.msk.f32.gmra.mrb[6].mxu0 %vm69_vm1, %v52_v8  ;;  %v60_v16 = vld [vmem:[%s1217_s1 + $0x78] sm:$0xff]  ;;  %v884_v17 = vld [vmem:[%s1216_s0] sm:$0xff]   ;;  %v885_v59 = vld [vmem:[%s1216_s0 + $0x8] sm:$0xff]   ;;  %s924_s25 = scalar_lea.vmem %s727_s24, 128  ;;  %p929_p1 = scmp.lt.s32.totalorder %s727_s24, %s727_s24 }
  0x11   :  { %817 = vmatprep.mubr.msk.f32.mxu0 %vm69_vm1, %v53_v9  ;;  %845 = vmatprep.mubr.bf16.mxu1 %v884_v17  ;;  %v734_v18 = vld [vmem:[%s1219_s3] ss:$0 sm:$0xff]  ;;  %v886_v60 = vld [vmem:[%s1216_s0 + $0x10] sm:$0xff]   ;;  %v887_v61 = vld [vmem:[%s1216_s0 + $0x18] sm:$0xff]   ;;  %p925_p0 = scmp.ne.s32.totalorder %s727_s24, %s924_s25  ;;  %p930_p2 = scmp.lt.s32.totalorder %s924_s25, %s924_s25 }
  0x12   :  { %v888_v62 = vld [vmem:[%s1216_s0 + $0x20] sm:$0xff]   ;;  %v889_v63 = vld [vmem:[%s1216_s0 + $0x28] sm:$0xff]   ;;  %v890_v0 = vld [vmem:[%s1216_s0 + $0x30] sm:$0xff]  }
  0x13   :  { %v891_v1 = vld [vmem:[%s1216_s0 + $0x38] sm:$0xff]   ;;  %v1085_v3 = vld [vmem:[%s1221_s5] ss:$0 sm:$0xff]  ;;  %p931_p3 = por %p930_p2, %p929_p1 }
  0x14   :  { %818 = vmatmul.mubr.msk.f32.gmra.mrb[8].mxu0 %vm69_vm1, %v54_v10 }
  0x15   :  { %820 = vmatprep.mubr.msk.f32.mxu0 %vm69_vm1, %v55_v11  ;;  %p932_p4 = pnand %p931_p3, %p925_p0 }
  0x18   :  { %821 = vmatmul.mubr.msk.f32.gmra.mrb[10].mxu0 %vm69_vm1, %v56_v12 }
  0x19   :  { %823 = vmatprep.mubr.msk.f32.mxu0 %vm69_vm1, %v57_v13 }
  0x1c   :  { %824 = vmatmul.mubr.msk.f32.gmra.mrb[12].mxu0 %vm69_vm1, %v58_v14 }
  0x1d   :  { %826 = vmatprep.mubr.msk.f32.mxu0 %vm69_vm1, %v59_v15 }
  0x20   :  { %827 = vmatmul.mubr.msk.f32.gmra.mrb[14].mxu0 %vm69_vm1, %v60_v16 }
  0x21   :  { %877 = vmatprep.mubr.msk.bf16.mxu0 %vm949_vm2, %v948_v2 }
  0xd7   :  { %v807_v19 = vpop.f32.mrb[0].mxu0 }
  0xd8   :  { %v194_v20 = vadd.f32 %v807_v19, %v734_v18  ;;  %v188_v21 = vpop.f32.mrb[1].mxu0 }
  0xd9   :  { %v189_v22 = vadd.f32 %v734_v18, %v188_v21 }
  0xdb   :  { %v810_v23 = vpop.f32.mrb[2].mxu0  ;;  %v267_v24 = vpack.c.bf16 %v194_v20, %v189_v22 }
  0xdc   :  { %v204_v25 = vadd.f32 %v810_v23, %v734_v18  ;;  %v198_v26 = vpop.f32.mrb[3].mxu0 }
  0xdd   :  { %v199_v27 = vadd.f32 %v734_v18, %v198_v26  ;;  %829 = vmatprep.subr.bf16.mxu1 %v267_v24 }
  0xde   :  { %830 = vmatpush3.bf16.msra.mxu1 %v267_v24 }
  0xdf   :  { %v268_v28 = vpack.c.bf16 %v204_v25, %v199_v27  ;;  %v813_v29 = vpop.f32.mrb[4].mxu0 }
  0xe0   :  { %v214_v30 = vadd.f32 %v813_v29, %v734_v18  ;;  %v208_v31 = vpop.f32.mrb[5].mxu0 }
  0xe1   :  { %v209_v32 = vadd.f32 %v734_v18, %v208_v31  ;;  %831 = vmatprep.subr.bf16.mxu1 %v268_v28 }
  0xe2   :  { %832 = vmatpush3.bf16.msra.mxu1 %v268_v28 }
  0xe3   :  { %v269_v33 = vpack.c.bf16 %v214_v30, %v209_v32  ;;  %v816_v34 = vpop.f32.mrb[6].mxu0 }
  0xe4   :  { %v224_v35 = vadd.f32 %v816_v34, %v734_v18  ;;  %v218_v36 = vpop.f32.mrb[7].mxu0 }
  0xe5   :  { %v219_v37 = vadd.f32 %v734_v18, %v218_v36  ;;  %833 = vmatprep.subr.bf16.mxu1 %v269_v33 }
  0xe6   :  { %834 = vmatpush3.bf16.msra.mxu1 %v269_v33 }
  0xe7   :  { %v270_v38 = vpack.c.bf16 %v224_v35, %v219_v37  ;;  %v819_v39 = vpop.f32.mrb[8].mxu0 }
  0xe8   :  { %v234_v40 = vadd.f32 %v819_v39, %v734_v18  ;;  %v228_v41 = vpop.f32.mrb[9].mxu0 }
  0xe9   :  { %v229_v42 = vadd.f32 %v734_v18, %v228_v41  ;;  %835 = vmatprep.subr.bf16.mxu1 %v270_v38 }
  0xea   :  { %836 = vmatpush3.bf16.msra.mxu1 %v270_v38 }
  0xeb   :  { %v271_v43 = vpack.c.bf16 %v234_v40, %v229_v42  ;;  %v822_v44 = vpop.f32.mrb[10].mxu0 }
  0xec   :  { %v244_v45 = vadd.f32 %v822_v44, %v734_v18  ;;  %v238_v46 = vpop.f32.mrb[11].mxu0 }
  0xed   :  { %v239_v47 = vadd.f32 %v734_v18, %v238_v46  ;;  %837 = vmatprep.subr.bf16.mxu1 %v271_v43 }
  0xee   :  { %838 = vmatpush3.bf16.msra.mxu1 %v271_v43 }
  0xef   :  { %v272_v48 = vpack.c.bf16 %v244_v45, %v239_v47  ;;  %v825_v49 = vpop.f32.mrb[12].mxu0 }
  0xf0   :  { %v254_v50 = vadd.f32 %v825_v49, %v734_v18  ;;  %v248_v51 = vpop.f32.mrb[13].mxu0 }
  0xf1   :  { %v249_v52 = vadd.f32 %v734_v18, %v248_v51  ;;  %839 = vmatprep.subr.bf16.mxu1 %v272_v48 }
  0xf2   :  { %840 = vmatpush3.bf16.msra.mxu1 %v272_v48 }
  0xf3   :  { %v273_v53 = vpack.c.bf16 %v254_v50, %v249_v52  ;;  %v828_v54 = vpop.f32.mrb[14].mxu0 }
  0xf4   :  { %v264_v55 = vadd.f32 %v828_v54, %v734_v18  ;;  %v258_v56 = vpop.f32.mrb[15].mxu0 }
  0xf5   :  { %v259_v57 = vadd.f32 %v734_v18, %v258_v56  ;;  %841 = vmatprep.subr.bf16.mxu1 %v273_v53 }
  0xf6   :  { %842 = vmatpush3.bf16.msra.mxu1 %v273_v53 }
  0xf7   :  { %v274_v58 = vpack.c.bf16 %v264_v55, %v259_v57 }
  0xf9   :  { %843 = vmatprep.subr.bf16.mxu1 %v274_v58 }
  0xfa   :  { %844 = vmatpush3.bf16.msra.mxu1 %v274_v58 }
  0xfd   :  { %846 = vmatmul.mubr.bf16.vlgmr.msra.gmra.mrb[0].mxu1 %v885_v59 }
  0xfe   :  { %849 = vmatprep.mubr.bf16.mxu1 %v886_v60 }
 0x105   :  { %850 = vmatmul.mubr.bf16.gmra.mrb[4].mxu1 %v887_v61 }
 0x106   :  { %853 = vmatprep.mubr.bf16.mxu1 %v888_v62 }
 0x10d   :  { %854 = vmatmul.mubr.bf16.gmra.mrb[8].mxu1 %v889_v63 }
 0x10e   :  { %857 = vmatprep.mubr.bf16.mxu1 %v890_v0 }
 0x115   :  { %858 = vmatmul.mubr.bf16.gmra.mrb[12].mxu1 %v891_v1 }
 0x1d0   :  { %v847_v4 = vpop.f32.mrb[0].mxu1 }
 0x1d1   :  { %v512_v5 = vadd.f32 %v847_v4, %v1085_v3  ;;  %v389_v6 = vpop.f32.mrb[1].mxu1 }
 0x1d2   :  { %v510_v7 = vadd.f32 %v1085_v3, %v389_v6  ;;  %v848_v8 = vpop.f32.mrb[2].mxu1 }
 0x1d3   :  { %v544_v9 = vmul.f32 0.044715, %v512_v5  ;;  %v513_v10 = vadd.f32 %v848_v8, %v1085_v3  ;;  %v392_v11 = vpop.f32.mrb[3].mxu1  ;;  %v1094_v27 = vmul.f32 0.5, %v512_v5 }
 0x1d4   :  { %v542_v12 = vmul.f32 0.044715, %v510_v7  ;;  %v511_v13 = vadd.f32 %v1085_v3, %v392_v11  ;;  %v1097_v32 = vmul.f32 0.5, %v510_v7 }
 0x1d5   :  { %v560_v14 = vmul.f32 %v544_v9, %v512_v5  ;;  %v545_v15 = vmul.f32 0.044715, %v513_v10  ;;  %v1108_v50 = vmul.f32 0.5, %v513_v10 }
 0x1d6   :  { %v558_v16 = vmul.f32 %v542_v12, %v510_v7  ;;  %v543_v17 = vmul.f32 0.044715, %v511_v13  ;;  %v1110_v54 = vmul.f32 0.5, %v511_v13 }
 0x1d7   :  { %v576_v18 = vmul.f32 %v560_v14, %v512_v5  ;;  %v561_v19 = vmul.f32 %v545_v15, %v513_v10 }
 0x1d8   :  { %v574_v20 = vmul.f32 %v558_v16, %v510_v7  ;;  %v559_v21 = vmul.f32 %v543_v17, %v511_v13  ;;  %v851_v22 = vpop.f32.mrb[4].mxu1 }
 0x1d9   :  { %v592_v23 = vadd.f32 %v576_v18, %v512_v5  ;;  %v577_v24 = vmul.f32 %v561_v19, %v513_v10  ;;  %v1092_v25 = vadd.f32 %v851_v22, %v1085_v3  ;;  %v405_v26 = vpop.f32.mrb[5].mxu1 }
 0x1da   :  { %v590_v28 = vadd.f32 %v574_v20, %v510_v7  ;;  %v575_v29 = vmul.f32 %v559_v21, %v511_v13  ;;  %v514_v30 = vadd.f32 %v1085_v3, %v405_v26  ;;  %v852_v31 = vpop.f32.mrb[6].mxu1 }
 0x1db   :  { %v608_v33 = vmul.f32 0.7978846, %v592_v23  ;;  %v593_v34 = vadd.f32 %v577_v24, %v513_v10  ;;  %v548_v35 = vmul.f32 0.044715, %v1092_v25  ;;  %v1101_v36 = vadd.f32 %v852_v31, %v1085_v3  ;;  %v408_v37 = vpop.f32.mrb[7].mxu1 }
 0x1dc   :  { %v606_v38 = vmul.f32 0.7978846, %v590_v28  ;;  %v591_v39 = vadd.f32 %v575_v29, %v511_v13  ;;  %v546_v40 = vmul.f32 0.044715, %v514_v30  ;;  %v515_v41 = vadd.f32 %v1085_v3, %v408_v37 }
 0x1dd   :  { %892 = vtanh.f32 %v608_v33  ;;  %v609_v42 = vmul.f32 0.7978846, %v593_v34  ;;  %v564_v43 = vmul.f32 %v548_v35, %v1092_v25  ;;  %v549_v44 = vmul.f32 0.044715, %v1101_v36 }
 0x1de   :  { %894 = vtanh.f32 %v606_v38  ;;  %v607_v45 = vmul.f32 0.7978846, %v591_v39  ;;  %v562_v46 = vmul.f32 %v546_v40, %v514_v30  ;;  %v547_v47 = vmul.f32 0.044715, %v515_v41 }
 0x1df   :  { %896 = vtanh.f32 %v609_v42  ;;  %v580_v48 = vmul.f32 %v564_v43, %v1092_v25  ;;  %v565_v49 = vmul.f32 %v549_v44, %v1101_v36  ;;  %v1112_v55 = vmul.f32 0.5, %v514_v30 }
 0x1e0   :  { %v578_v51 = vmul.f32 %v562_v46, %v514_v30  ;;  %v563_v52 = vmul.f32 %v547_v47, %v515_v41  ;;  %v855_v53 = vpop.f32.mrb[8].mxu1  ;;  %898 = vtanh.f32 %v607_v45  ;;  %v1122_v0 = vmul.f32 0.5, %v515_v41 }
 0x1e1   :  { %v596_v56 = vadd.f32 %v580_v48, %v1092_v25  ;;  %v581_v57 = vmul.f32 %v565_v49, %v1101_v36  ;;  %v1117_v58 = vadd.f32 %v855_v53, %v1085_v3  ;;  %v421_v59 = vpop.f32.mrb[9].mxu1  ;;  %v1140_v21 = vmul.f32 0.5, %v1092_v25 }
 0x1e2   :  { %v594_v60 = vadd.f32 %v578_v51, %v514_v30  ;;  %v579_v61 = vmul.f32 %v563_v52, %v515_v41  ;;  %v1120_v62 = vadd.f32 %v1085_v3, %v421_v59  ;;  %v856_v63 = vpop.f32.mrb[10].mxu1 }
 0x1e3   :  { %v612_v1 = vmul.f32 0.7978846, %v596_v56  ;;  %v597_v4 = vadd.f32 %v581_v57, %v1101_v36  ;;  %v552_v5 = vmul.f32 0.044715, %v1117_v58  ;;  %v1127_v6 = vadd.f32 %v856_v63, %v1085_v3  ;;  %v424_v7 = vpop.f32.mrb[11].mxu1 }
 0x1e4   :  { %v610_v8 = vmul.f32 0.7978846, %v594_v60  ;;  %v595_v9 = vadd.f32 %v579_v61, %v515_v41  ;;  %v550_v10 = vmul.f32 0.044715, %v1120_v62  ;;  %v1131_v11 = vadd.f32 %v1085_v3, %v424_v7 }
 0x1e5   :  { %900 = vtanh.f32 %v612_v1  ;;  %v613_v12 = vmul.f32 0.7978846, %v597_v4  ;;  %v568_v13 = vmul.f32 %v552_v5, %v1117_v58  ;;  %v553_v14 = vmul.f32 0.044715, %v1127_v6 }
 0x1e6   :  { %902 = vtanh.f32 %v610_v8  ;;  %v611_v15 = vmul.f32 0.7978846, %v595_v9  ;;  %v566_v16 = vmul.f32 %v550_v10, %v1120_v62  ;;  %v551_v17 = vmul.f32 0.044715, %v1131_v11 }
 0x1e7   :  { %v893_v18 = vpop.eup %892  ;;  %904 = vtanh.f32 %v613_v12  ;;  %v584_v19 = vmul.f32 %v568_v13, %v1117_v58  ;;  %v569_v20 = vmul.f32 %v553_v14, %v1127_v6 }
 0x1e8   :  { %v895_v22 = vpop.eup %894  ;;  %906 = vtanh.f32 %v611_v15  ;;  %v582_v23 = vmul.f32 %v566_v16, %v1120_v62  ;;  %v567_v24 = vmul.f32 %v551_v17, %v1131_v11  ;;  %v859_v26 = vpop.f32.mrb[12].mxu1  ;;  %v640_v28 = vadd.f32 1.0, %v893_v18 }
 0x1e9   :  { %v897_v29 = vpop.eup %896  ;;  %v600_v30 = vadd.f32 %v584_v19, %v1117_v58  ;;  %v585_v31 = vmul.f32 %v569_v20, %v1127_v6  ;;  %v1147_v33 = vadd.f32 %v859_v26, %v1085_v3  ;;  %v437_v34 = vpop.f32.mrb[13].mxu1  ;;  %v638_v35 = vadd.f32 1.0, %v895_v22 }
 0x1ea   :  { %v598_v25 = vadd.f32 %v582_v23, %v1120_v62  ;;  %v583_v37 = vmul.f32 %v567_v24, %v1131_v11  ;;  %v1152_v38 = vadd.f32 %v1085_v3, %v437_v34  ;;  %v860_v39 = vpop.f32.mrb[14].mxu1  ;;  %v641_v40 = vadd.f32 1.0, %v897_v29  ;;  %v899_v41 = vpop.eup %898 }
 0x1eb   :  { %v616_v42 = vmul.f32 0.7978846, %v600_v30  ;;  %v601_v43 = vadd.f32 %v585_v31, %v1127_v6  ;;  %v556_v44 = vmul.f32 0.044715, %v1147_v33  ;;  %v1157_v45 = vadd.f32 %v860_v39, %v1085_v3  ;;  %v440_v46 = vpop.f32.mrb[15].mxu1 }
 0x1ec   :  { %v614_v47 = vmul.f32 0.7978846, %v598_v25  ;;  %v599_v48 = vadd.f32 %v583_v37, %v1131_v11  ;;  %v554_v49 = vmul.f32 0.044715, %v1152_v38  ;;  %v1162_v51 = vadd.f32 %v1085_v3, %v440_v46 }
 0x1ed   :  { %908 = vtanh.f32 %v616_v42  ;;  %v617_v52 = vmul.f32 0.7978846, %v601_v43  ;;  %v572_v53 = vmul.f32 %v556_v44, %v1147_v33  ;;  %v557_v56 = vmul.f32 0.044715, %v1157_v45 }
 0x1ee   :  { %910 = vtanh.f32 %v614_v47  ;;  %v615_v57 = vmul.f32 0.7978846, %v599_v48  ;;  %v570_v59 = vmul.f32 %v554_v49, %v1152_v38  ;;  %v555_v60 = vmul.f32 0.044715, %v1162_v51 }
 0x1ef   :  { %v901_v61 = vpop.eup %900  ;;  %912 = vtanh.f32 %v617_v52  ;;  %v588_v63 = vmul.f32 %v572_v53, %v1147_v33  ;;  %v573_v1 = vmul.f32 %v557_v56, %v1157_v45  ;;  %v639_v3 = vadd.f32 1.0, %v899_v41 }
 0x1f0   :  { %v903_v4 = vpop.eup %902  ;;  %914 = vtanh.f32 %v615_v57  ;;  %v586_v5 = vmul.f32 %v570_v59, %v1152_v38  ;;  %v571_v7 = vmul.f32 %v555_v60, %v1162_v51  ;;  %v654_v8 = vmul.f32 %v638_v35, %v1097_v32 }
 0x1f1   :  { %v905_v9 = vpop.eup %904  ;;  %v604_v10 = vadd.f32 %v588_v63, %v1147_v33  ;;  %v589_v12 = vmul.f32 %v573_v1, %v1157_v45  ;;  %v655_v13 = vmul.f32 %v639_v3, %v1110_v54  ;;  %v656_v14 = vmul.f32 %v640_v28, %v1094_v27 }
 0x1f2   :  { %v907_v15 = vpop.eup %906  ;;  %v602_v16 = vadd.f32 %v586_v5, %v1152_v38  ;;  %v587_v17 = vmul.f32 %v571_v7, %v1162_v51  ;;  %v657_v18 = vmul.f32 %v641_v40, %v1108_v50  ;;  %v642_v19 = vadd.f32 1.0, %v903_v4 }
 0x1f3   :  { %v620_v20 = vmul.f32 0.7978846, %v604_v10  ;;  %v605_v32 = vadd.f32 %v589_v12, %v1157_v45  ;;  %v671_v22 = vpack.c.bf16 %v655_v13, %v654_v8  ;;  %v643_v23 = vadd.f32 1.0, %v907_v15 }
 0x1f4   :  { %v618_v24 = vmul.f32 0.7978846, %v602_v16  ;;  %v603_v26 = vadd.f32 %v587_v17, %v1162_v51  ;;  %v672_v29 = vpack.c.bf16 %v657_v18, %v656_v14  ;;  %v658_v54 = vmul.f32 %v642_v19, %v1112_v55 }
 0x1f5   :  { %916 = vtanh.f32 %v620_v20  ;;  %v621_v27 = vmul.f32 0.7978846, %v605_v32  ;;  %862 = vmatpush3.bf16.msra.mxu0 %v671_v22  ;;  %v659_v28 = vmul.f32 %v643_v23, %v1122_v0  ;;  %v644_v30 = vadd.f32 1.0, %v901_v61 }
 0x1f6   :  { %918 = vtanh.f32 %v618_v24  ;;  %v619_v50 = vmul.f32 0.7978846, %v603_v26  ;;  %863 = vmatprep.subr.bf16.mxu0 %v948_v2  ;;  %v533_v31 = vmul.f32 0.5, %v1101_v36  ;;  %v645_v34 = vadd.f32 1.0, %v905_v9 }
 0x1f7   :  { %v909_v35 = vpop.eup %908  ;;  %920 = vtanh.f32 %v621_v27  ;;  %v673_v25 = vpack.c.bf16 %v659_v28, %v658_v54  ;;  %v660_v55 = vmul.f32 %v644_v30, %v1140_v21  ;;  %v536_v44 = vmul.f32 0.5, %v1117_v58 }
 0x1f8   :  { %v911_v37 = vpop.eup %910  ;;  %922 = vtanh.f32 %v619_v50  ;;  %v661_v39 = vmul.f32 %v645_v34, %v533_v31  ;;  %v648_v40 = vadd.f32 1.0, %v909_v35  ;;  %v537_v36 = vmul.f32 0.5, %v1127_v6 }
 0x1f9   :  { %v913_v41 = vpop.eup %912  ;;  %864 = vmatpush3.bf16.msra.mxu0 %v672_v29  ;;  %v646_v0 = vadd.f32 1.0, %v911_v37  ;;  %v534_v47 = vmul.f32 0.5, %v1120_v62  ;;  %v535_v48 = vmul.f32 0.5, %v1131_v11  ;;  %v540_v62 = vmul.f32 0.5, %v1147_v33  ;;  %v670_v33 = vld [vmem:[%s1220_s4] sm:$0xf] }
 0x1fa   :  { %v915_v42 = vpop.eup %914  ;;  %865 = vmatprep.subr.bf16.mxu0 %v948_v2  ;;  %v674_v43 = vpack.c.bf16 %v661_v39, %v660_v55  ;;  %v649_v46 = vadd.f32 1.0, %v913_v41  ;;  %v664_v21 = vmul.f32 %v648_v40, %v536_v44  ;;  %v541_v11 = vmul.f32 0.5, %v1157_v45 }
 0x1fb   :  { %v647_v49 = vadd.f32 1.0, %v915_v42  ;;  %v662_v53 = vmul.f32 %v646_v0, %v534_v47  ;;  %v538_v4 = vmul.f32 0.5, %v1152_v38  ;;  %v539_v5 = vmul.f32 0.5, %v1162_v51 }
 0x1fc   :  { %v665_v52 = vmul.f32 %v649_v46, %v537_v36 }
 0x1fd   :  { %866 = vmatpush3.bf16.msra.mxu0 %v673_v25  ;;  %v663_v56 = vmul.f32 %v647_v49, %v535_v48 }
 0x1fe   :  { %867 = vmatprep.subr.bf16.mxu0 %v948_v2  ;;  %v676_v57 = vpack.c.bf16 %v665_v52, %v664_v21 }
 0x1ff   :  { %v917_v59 = vpop.eup %916  ;;  %v675_v60 = vpack.c.bf16 %v663_v56, %v662_v53 }
 0x200   :  { %v919_v61 = vpop.eup %918  ;;  %v652_v58 = vadd.f32 1.0, %v917_v59 }
 0x201   :  { %v921_v63 = vpop.eup %920  ;;  %868 = vmatpush3.bf16.msra.mxu0 %v674_v43  ;;  %v650_v6 = vadd.f32 1.0, %v919_v61 }
 0x202   :  { %v923_v1 = vpop.eup %922  ;;  %869 = vmatprep.subr.bf16.mxu0 %v948_v2  ;;  %v653_v3 = vadd.f32 1.0, %v921_v63  ;;  %v668_v8 = vmul.f32 %v652_v58, %v540_v62 }
 0x203   :  { %v651_v7 = vadd.f32 1.0, %v923_v1  ;;  %v666_v10 = vmul.f32 %v650_v6, %v538_v4 }
 0x204   :  { %v669_v9 = vmul.f32 %v653_v3, %v541_v11 }
 0x205   :  { %870 = vmatpush3.bf16.msra.mxu0 %v675_v60  ;;  %v667_v12 = vmul.f32 %v651_v7, %v539_v5 }
 0x206   :  { %871 = vmatprep.subr.bf16.mxu0 %v948_v2  ;;  %v678_v13 = vpack.c.bf16 %v669_v9, %v668_v8 }
 0x207   :  { %v677_v14 = vpack.c.bf16 %v667_v12, %v666_v10 }
 0x209   :  { %872 = vmatpush3.bf16.msra.mxu0 %v676_v57 }
 0x20a   :  { %873 = vmatprep.subr.bf16.mxu0 %v948_v2 }
 0x20d   :  { %874 = vmatpush3.bf16.msra.mxu0 %v677_v14 }
 0x20e   :  { %875 = vmatprep.subr.bf16.mxu0 %v948_v2 }
 0x211   :  { %876 = vmatpush3.bf16.msra.mxu0 %v678_v13 }
 0x214   :  { %878 = vmatmul.mubr.bf16.vlgmr.msra.gmra.mrb[16].mxu0 %v670_v33 }
 0x2e7   :  { %v713_v38 = vpop.f32.mrb[16].mxu0 }
 0x2e8   :  { %719 = vst [vmem:[#allocation3] sm:$0xff] %v713_v38  ;;  %v879_v45 = vpop.f32.mrb[17].mxu0 }
 0x2e9   :  { %v716_v51 = vpop.f32.mrb[18].mxu0 }
 0x2ea   :  { %935 = shalt.err (!%p932_p4)
}
 0x2eb   :  { %s936_s28 = scalar_lea.hbm %s1222_s6, 128 }
 0x2ec   :  { %p937_p5 = scmp.ne.s32.totalorder %s1222_s6, %s936_s28  ;;  %p940_p6 = scmp.lt.u32.totalorder %s936_s28, %s1222_s6 }
 0x2ee   :  { %p942_p7 = pnand %p940_p6, %p937_p5 }
 0x2f0   :  { %945 = shalt.err (!%p942_p7)
}
 0x2f1   :  { %729 = dma.vmem_to_hbm [thread:$0]  %s727_s24, 128, %s1222_s6, [#allocation4]   ;;  %v880_v2 = vpop.f32.mrb[19].mxu0 }
 0x2f2   :  { %946 = dma.done.wait [#allocation4], 128  }
 0x2f3   :  { %947 = vsyncadd [#allocation4], 4294967168 }
 0x2f4   :  { %733 = vsyncpa [#allocation4], 1 }

</bundles_post_ra>
